<compile_context>
chip_gen: v5e
topology: v5e:2x2
jax: 0.10.0
libtpu: 0.0.40
codegen_flags: <defaults>
</compile_context>

<pallas_src>
import functools

import jax
import jax.numpy as jnp
from jax.experimental import pallas as pl
from jax.experimental.pallas import tpu as pltpu

IN_FEATURES = 28 * 28   # 784
OUT_FEATURES = 10
N_PAD = 128             # lane-dense output width


def _round_up(x, m):
    return ((x + m - 1) // m) * m


def _chip_defaults():
    """(block_b, core_split) chosen from the attached TPU generation.

    v5e (and older / unknown): TB=1024 keeps the double-buffered working set
      (~9 MiB) inside the 16 MiB default scoped VMEM.
    v6e: TB=2048 (~17 MiB, fits 32 MiB scoped VMEM) better amortizes the
      fixed per-grid-step pipeline overhead.
    v7x: TB=2048 as well, plus core_split=2 so the batch grid has at least
      two blocks and both TensorCores are used.
    """
    try:
        kind = jax.devices()[0].device_kind.lower()
    except Exception:
        return 1024, 1
    if "v7" in kind:
        return 2048, 2
    if "v6" in kind:
        return 2048, 1
    return 1024, 1


def _linear_kernel(x_ref, wt_ref, b_ref, o_ref):
    # Hot path: one MXU matmul per batch tile (f32 accumulation) + bias add.
    acc = jnp.dot(x_ref[...], wt_ref[...],
                  preferred_element_type=jnp.float32)      # [TB, 128] f32
    o_ref[...] = (acc + b_ref[...]).astype(o_ref.dtype)


def prepare_params(weight, bias, param_dtype=None):
    """One-time parameter prep: transpose + zero-pad N to 128 lanes.

    weight: [10, 784] (PyTorch layout); bias: [10].
    param_dtype: optionally store the weight in bf16 (f32 accumulation keeps
      accuracy loss to input rounding only). Bias stays f32 (added post-MXU).
    Returns wt_pad [784, 128], b_pad [1, 128] (f32).
    """
    w = weight if param_dtype is None else weight.astype(param_dtype)
    wt_pad = jnp.zeros((IN_FEATURES, N_PAD), w.dtype)
    wt_pad = wt_pad.at[:, :OUT_FEATURES].set(w.T)
    b_pad = jnp.zeros((1, N_PAD), jnp.float32)
    b_pad = b_pad.at[:, :OUT_FEATURES].set(bias.astype(jnp.float32))
    return wt_pad, b_pad


@functools.partial(jax.jit, static_argnames=("block_b", "core_split"))
def logistic_regression_forward(x, wt_pad, b_pad, *, block_b=None, core_split=None):
    """x: [B, 784]; wt_pad: [784, 128]; b_pad: [1, 128] (f32).

    Returns (logits [B, 10], x) to mirror the PyTorch module's (output, x).
    Feed x / wt_pad in bf16 from the producer for ~2x less HBM traffic.
    """
    B = x.shape[0]

    if block_b is None or core_split is None:
        d_bb, d_cs = _chip_defaults()
        block_b = d_bb if block_b is None else block_b
        core_split = d_cs if core_split is None else core_split

    # Batch tile: multiple of 8 (sublane), capped per chip; on multi-core
    # chips ensure >= core_split grid blocks so every TensorCore gets work.
    TB = min(block_b, _round_up(B, 8))
    if core_split > 1:
        TB = min(TB, _round_up(pl.cdiv(B, core_split), 8))
    grid = (pl.cdiv(B, TB),)   # no wrapper-side padding of x

    cost = pl.CostEstimate(
        flops=2 * B * IN_FEATURES * OUT_FEATURES,
        transcendentals=0,
        bytes_accessed=(B * IN_FEATURES * x.dtype.itemsize
                        + IN_FEATURES * N_PAD * wt_pad.dtype.itemsize
                        + B * N_PAD * x.dtype.itemsize),
    )

    out = pl.pallas_call(
        _linear_kernel,
        out_shape=jax.ShapeDtypeStruct((B, N_PAD), x.dtype),
        grid_spec=pltpu.PrefetchScalarGridSpec(
            num_scalar_prefetch=0,
            grid=grid,
            in_specs=[
                # x: tiled over batch, double-buffered by the pipeline.
                pl.BlockSpec((TB, IN_FEATURES), lambda i: (i, 0)),
                # weight / bias: resident across all grid steps.
                pl.BlockSpec((IN_FEATURES, N_PAD), lambda i: (0, 0)),
                pl.BlockSpec((1, N_PAD), lambda i: (0, 0)),
            ],
            out_specs=pl.BlockSpec((TB, N_PAD), lambda i: (i, 0)),
        ),
        compiler_params=pltpu.CompilerParams(
            dimension_semantics=("parallel",),
        ),
        cost_estimate=cost,
    )(x, wt_pad, b_pad)

    logits = out[:, :OUT_FEATURES]
    return logits, x


if __name__ == "__main__":
    key = jax.random.PRNGKey(0)
    k_x, k_w, k_b = jax.random.split(key, 3)

    batch = 8
    # Deterministic synthetic inputs / parameters (PyTorch-like uniform init).
    x = jax.random.normal(k_x, (batch, IN_FEATURES), dtype=jnp.float32)
    bound = 1.0 / (IN_FEATURES ** 0.5)
    weight = jax.random.uniform(
        k_w, (OUT_FEATURES, IN_FEATURES), dtype=jnp.float32,
        minval=-bound, maxval=bound)
    bias = jax.random.uniform(
        k_b, (OUT_FEATURES,), dtype=jnp.float32, minval=-bound, maxval=bound)

    ref = x @ weight.T + bias

    # f32 path (matches the PyTorch module's numerics).
    wt_pad, b_pad = prepare_params(weight, bias)
    out, x_echo = logistic_regression_forward(x, wt_pad, b_pad)
    jax.block_until_ready((out, x_echo))
    assert out.shape == (batch, OUT_FEATURES)
    assert x_echo.shape == (batch, IN_FEATURES)
    assert jnp.allclose(out, ref, atol=1e-4, rtol=1e-4)
    assert jnp.allclose(x_echo, x)

    # bf16-producer path (~2x less HBM traffic; accumulation stays f32).
    x_bf16 = x.astype(jnp.bfloat16)
    wt_bf16, b_pad_bf = prepare_params(weight, bias, param_dtype=jnp.bfloat16)
    out_bf16, _ = logistic_regression_forward(x_bf16, wt_bf16, b_pad_bf)
    jax.block_until_ready(out_bf16)
    assert out_bf16.shape == (batch, OUT_FEATURES)
    assert jnp.allclose(out_bf16.astype(jnp.float32), ref, atol=5e-2, rtol=5e-2)

    print("KERNEL_OK")
</pallas_src>

<mosaic_0001>
module attributes {stable_mosaic.version = 11 : i64} {
  func.func @_linear_kernel(%arg0: i32, %arg1: memref<8x784xf32, #tpu.memory_space<vmem>>, %arg2: memref<784x128xf32, #tpu.memory_space<vmem>>, %arg3: memref<1x128xf32, #tpu.memory_space<vmem>>, %arg4: memref<8x128xf32, #tpu.memory_space<vmem>>) attributes {dimension_semantics = [#tpu.dimension_semantics<parallel>], iteration_bounds = array<i64: 1>, scalar_prefetch = 0 : i64, scratch_operands = 0 : i64, tpu.core_type = #tpu.core_type<tc>, window_params = [{transform_indices = @transform_0, window_bounds = array<i64: 8, 784>}, {pipeline_mode = #tpu.pipeline_mode<synchronous>, transform_indices = @transform_1, window_bounds = array<i64: 784, 128>}, {pipeline_mode = #tpu.pipeline_mode<synchronous>, transform_indices = @transform_2, window_bounds = array<i64: 1, 128>}, {transform_indices = @transform_3, window_bounds = array<i64: 8, 128>}]} {
    %c0 = arith.constant 0 : index
    %c0_0 = arith.constant 0 : index
    %0 = vector.load %arg1[%c0, %c0_0] : memref<8x784xf32, #tpu.memory_space<vmem>>, vector<8x784xf32>
    %c0_1 = arith.constant 0 : index
    %c0_2 = arith.constant 0 : index
    %1 = vector.load %arg2[%c0_1, %c0_2] : memref<784x128xf32, #tpu.memory_space<vmem>>, vector<784x128xf32>
    %cst = arith.constant dense<0.000000e+00> : vector<8x128xf32>
    %2 = tpu.matmul %0, %1, %cst {dimension_numbers = #tpu.dot_dimension_numbers<[1], [0], [0], [1], [0, 0, 1, 1], [], []>} : vector<8x784xf32>, vector<784x128xf32>, vector<8x128xf32> -> vector<8x128xf32>
    %c0_3 = arith.constant 0 : index
    %c0_4 = arith.constant 0 : index
    %3 = vector.load %arg3[%c0_3, %c0_4] : memref<1x128xf32, #tpu.memory_space<vmem>>, vector<1x128xf32>
    %4 = vector.broadcast %3 : vector<1x128xf32> to vector<8x128xf32>
    %5 = arith.addf %2, %4 : vector<8x128xf32>
    %c0_5 = arith.constant 0 : index
    %c0_6 = arith.constant 0 : index
    %6 = vector.load %arg4[%c0_5, %c0_6] : memref<8x128xf32, #tpu.memory_space<vmem>>, vector<8x128xf32>
    tpu.vector_store %arg4[%c0_5, %c0_6], %5 {strides = array<i32>} : memref<8x128xf32, #tpu.memory_space<vmem>>, vector<8x128xf32>,
    return
  }
  func.func @transform_0(%arg0: i32) -> (i32, i32) {
    %c0_i32 = arith.constant 0 : i32
    %c0_i32_0 = arith.constant 0 : i32
    return %arg0, %c0_i32 : i32, i32
  }
  func.func @transform_1(%arg0: i32) -> (i32, i32) {
    %c0_i32 = arith.constant 0 : i32
    %c0_i32_0 = arith.constant 0 : i32
    %c0_i32_1 = arith.constant 0 : i32
    return %c0_i32, %c0_i32_0 : i32, i32
  }
  func.func @transform_2(%arg0: i32) -> (i32, i32) {
    %c0_i32 = arith.constant 0 : i32
    %c0_i32_0 = arith.constant 0 : i32
    %c0_i32_1 = arith.constant 0 : i32
    return %c0_i32, %c0_i32_0 : i32, i32
  }
  func.func @transform_3(%arg0: i32) -> (i32, i32) {
    %c0_i32 = arith.constant 0 : i32
    %c0_i32_0 = arith.constant 0 : i32
    return %arg0, %c0_i32 : i32, i32
  }
}

</mosaic_0001>

<bundles_post_ra>
// kernel: logistic_regression_forward.1
= control target key start
LH: loop header
LB: loop body
LE: loop exit
PB: predicated region body
PF: predicated region fallthrough
CT: control target
= control target key end

     0   :  { %8 = vsyncpa [#allocation3], 0  ;;  %s478_s0 = inlined_call_operand.hbm [shape: f32[8,784], index: 0, kind: input, shape index: {}]   ;;  %s479_s1 = inlined_call_operand.hbm [shape: f32[784,128], index: 1, kind: input, shape index: {}]   ;;  %s480_s2 = inlined_call_operand.hbm [shape: f32[1,128], index: 2, kind: input, shape index: {}]   ;;  %s481_s3 = inlined_call_operand.hbm [shape: f32[8,128], index: 3, kind: output, shape index: {}]  }
   0x1   :  { %9 = vsyncpa [#allocation6], 0  ;;  %s26_s14 = sshll.u32 %s479_s1, 4  ;;  %s27_s14 = int_to_ptr.hbm [resolvable:$true] %s26_s14 }
   0x2   :  { %10 = vsyncpa [#allocation4], 0  ;;  %s440_s15 = smov [#allocation5]   ;;  %s16_s19 = sshll.u32 %s478_s0, 4  ;;  %s17_s19 = int_to_ptr.hbm [resolvable:$true] %s16_s19 }
   0x3   :  { %s28_s16 = sshll.u32 %s440_s15, 4  ;;  %s441_s20 = smov 128   ;;  %s29_s16 = int_to_ptr.vmem [resolvable:$true] %s28_s16 }
   0x4   :  { %s442_s21 = smov 8   ;;  %s443_s22 = smov [#allocation2]  }
   0x5   :  { %34 = dma.hbm_to_vmem [thread:$0]  %s27_s14, 12544, %s29_s16, [#allocation6], %s441_s20, %s441_s20, %s442_s21  }
   0x6   :  { %s18_s23 = sshll.u32 %s443_s22, 4  ;;  %s40_s26 = sshll.u32 %s480_s2, 4  ;;  %s19_s23 = int_to_ptr.vmem [resolvable:$true] %s18_s23  ;;  %s41_s26 = int_to_ptr.hbm [resolvable:$true] %s40_s26 }
   0x7   :  { %21 = dma.hbm_to_vmem [thread:$0]  %s17_s19, 896, %s19_s23, [#allocation3]  }
   0x8   :  { %s444_s1 = smov [#allocation7]  }
   0x9   :  { %s42_s27 = sshll.u32 %s444_s1, 4  ;;  %s43_s27 = int_to_ptr.vmem [resolvable:$true] %s42_s27 }
   0xa   :  { %45 = dma.hbm_to_vmem [thread:$0]  %s41_s26, 16, %s43_s27, [#allocation6]  }
   0xb   :  { %434 = dma.done.wait [#allocation3], 896  }
   0xc   :  { %435 = vsyncadd [#allocation3], 4294966400 }
   0xd   :  { %436 = dma.done.wait [#allocation6], 12560  }
   0xe   :  { %437 = vsyncadd [#allocation6], 4294954736  ;;  %v80_v0 = vld [vmem:[#allocation5 + $0x78] sm:$0xff]  ;;  %v79_v1 = vld [vmem:[#allocation5 + $0x70] sm:$0xff]  ;;  %vm167_vm0 = vcmask 130048   ;;  %s445_s0 = smov [#allocation8]  }
   0xf   :  { %v96_v2 = vld [vmem:[#allocation5 + $0xf8] sm:$0xff]  ;;  %171 = vmatpush.msra.mxu0 %v80_v0  ;;  %v95_v3 = vld [vmem:[#allocation5 + $0xf0] sm:$0xff]  ;;  %v78_v4 = vld [vmem:[#allocation5 + $0x68] sm:$0xff]  ;;  %s317_s2 = sshll.u32 %s445_s0, 4  ;;  %s319_s30 = sshll.u32 %s481_s3, 4  ;;  %s318_s2 = int_to_ptr.vmem [resolvable:$true] %s317_s2  ;;  %s320_s30 = int_to_ptr.hbm [resolvable:$true] %s319_s30 }
  0x10   :  { %191 = vmatpush.msra.mxu1 %v96_v2  ;;  %v94_v5 = vld [vmem:[#allocation5 + $0xe8] sm:$0xff]  ;;  %v77_v6 = vld [vmem:[#allocation5 + $0x60] sm:$0xff]  ;;  %v76_v8 = vld [vmem:[#allocation5 + $0x58] sm:$0xff] }
  0x11   :  { %172 = vmatpush.msra.mxu0 %v79_v1  ;;  %v93_v7 = vld [vmem:[#allocation5 + $0xe0] sm:$0xff]  ;;  %v92_v9 = vld [vmem:[#allocation5 + $0xd8] sm:$0xff]  ;;  %v75_v10 = vld [vmem:[#allocation5 + $0x50] sm:$0xff] }
  0x12   :  { %192 = vmatpush.msra.mxu1 %v95_v3  ;;  %v112_v11 = vld [vmem:[#allocation5 + $0x178] sm:$0xff]  ;;  %v91_v12 = vld [vmem:[#allocation5 + $0xd0] sm:$0xff]  ;;  %v110_v15 = vld [vmem:[#allocation5 + $0x168] sm:$0xff] }
  0x13   :  { %173 = vmatpush.msra.mxu0 %v78_v4  ;;  %211 = vmatpush.msra.mxu2 %v112_v11  ;;  %v111_v13 = vld [vmem:[#allocation5 + $0x170] sm:$0xff]  ;;  %v128_v14 = vld [vmem:[#allocation5 + $0x1f8] sm:$0xff]  ;;  %v74_v17 = vld [vmem:[#allocation5 + $0x48] sm:$0xff] }
  0x14   :  { %193 = vmatpush.msra.mxu1 %v94_v5  ;;  %v127_v16 = vld [vmem:[#allocation5 + $0x1f0] sm:$0xff]  ;;  %v90_v18 = vld [vmem:[#allocation5 + $0xc8] sm:$0xff]  ;;  %231 = vmatpush.msra.mxu3 %v128_v14  ;;  %v109_v19 = vld [vmem:[#allocation5 + $0x160] sm:$0xff] }
  0x15   :  { %174 = vmatpush.msra.mxu0 %v77_v6  ;;  %212 = vmatpush.msra.mxu2 %v111_v13  ;;  %v126_v20 = vld [vmem:[#allocation5 + $0x1e8] sm:$0xff]  ;;  %v73_v21 = vld [vmem:[#allocation5 + $0x40] sm:$0xff]  ;;  %v108_v23 = vld [vmem:[#allocation5 + $0x158] sm:$0xff] }
  0x16   :  { %194 = vmatpush.msra.mxu1 %v93_v7  ;;  %v89_v22 = vld [vmem:[#allocation5 + $0xc0] sm:$0xff]  ;;  %232 = vmatpush.msra.mxu3 %v127_v16  ;;  %v72_v25 = vld [vmem:[#allocation5 + $0x38] sm:$0xff]  ;;  %v107_v27 = vld [vmem:[#allocation5 + $0x150] sm:$0xff] }
  0x17   :  { %175 = vmatpush.msra.mxu0 %v76_v8  ;;  %213 = vmatpush.msra.mxu2 %v110_v15  ;;  %v125_v24 = vld [vmem:[#allocation5 + $0x1e0] sm:$0xff]  ;;  %v88_v26 = vld [vmem:[#allocation5 + $0xb8] sm:$0xff]  ;;  %v71_v29 = vld [vmem:[#allocation5 + $0x30] sm:$0xff] }
  0x18   :  { %195 = vmatpush.msra.mxu1 %v92_v9  ;;  %233 = vmatpush.msra.mxu3 %v126_v20  ;;  %v124_v28 = vld [vmem:[#allocation5 + $0x1d8] sm:$0xff]  ;;  %v87_v30 = vld [vmem:[#allocation5 + $0xb0] sm:$0xff]  ;;  %v106_v31 = vld [vmem:[#allocation5 + $0x148] sm:$0xff] }
  0x19   :  { %176 = vmatpush.msra.mxu0 %v75_v10  ;;  %214 = vmatpush.msra.mxu2 %v109_v19  ;;  %v123_v32 = vld [vmem:[#allocation5 + $0x1d0] sm:$0xff]  ;;  %v70_v33 = vld [vmem:[#allocation5 + $0x28] sm:$0xff]  ;;  %v105_v35 = vld [vmem:[#allocation5 + $0x140] sm:$0xff] }
  0x1a   :  { %196 = vmatpush.msra.mxu1 %v91_v12  ;;  %234 = vmatpush.msra.mxu3 %v125_v24  ;;  %v86_v34 = vld [vmem:[#allocation5 + $0xa8] sm:$0xff]  ;;  %v69_v37 = vld [vmem:[#allocation5 + $0x20] sm:$0xff]  ;;  %v104_v39 = vld [vmem:[#allocation5 + $0x138] sm:$0xff] }
  0x1b   :  { %177 = vmatpush.msra.mxu0 %v74_v17  ;;  %215 = vmatpush.msra.mxu2 %v108_v23  ;;  %v122_v36 = vld [vmem:[#allocation5 + $0x1c8] sm:$0xff]  ;;  %v85_v38 = vld [vmem:[#allocation5 + $0xa0] sm:$0xff]  ;;  %v68_v41 = vld [vmem:[#allocation5 + $0x18] sm:$0xff] }
  0x1c   :  { %197 = vmatpush.msra.mxu1 %v90_v18  ;;  %235 = vmatpush.msra.mxu3 %v124_v28  ;;  %v121_v40 = vld [vmem:[#allocation5 + $0x1c0] sm:$0xff]  ;;  %v84_v42 = vld [vmem:[#allocation5 + $0x98] sm:$0xff]  ;;  %v103_v43 = vld [vmem:[#allocation5 + $0x130] sm:$0xff] }
  0x1d   :  { %178 = vmatpush.msra.mxu0 %v73_v21  ;;  %216 = vmatpush.msra.mxu2 %v107_v27  ;;  %v120_v44 = vld [vmem:[#allocation5 + $0x1b8] sm:$0xff]  ;;  %v67_v45 = vld [vmem:[#allocation5 + $0x10] sm:$0xff]  ;;  %v102_v47 = vld [vmem:[#allocation5 + $0x128] sm:$0xff] }
  0x1e   :  { %198 = vmatpush.msra.mxu1 %v89_v22  ;;  %236 = vmatpush.msra.mxu3 %v123_v32  ;;  %v83_v46 = vld [vmem:[#allocation5 + $0x90] sm:$0xff]  ;;  %v66_v49 = vld [vmem:[#allocation5 + $0x8] sm:$0xff]  ;;  %v101_v51 = vld [vmem:[#allocation5 + $0x120] sm:$0xff] }
  0x1f   :  { %179 = vmatpush.msra.mxu0 %v72_v25  ;;  %217 = vmatpush.msra.mxu2 %v106_v31  ;;  %v119_v48 = vld [vmem:[#allocation5 + $0x1b0] sm:$0xff]  ;;  %v82_v50 = vld [vmem:[#allocation5 + $0x88] sm:$0xff]  ;;  %v65_v53 = vld [vmem:[#allocation5] sm:$0xff] }
  0x20   :  { %199 = vmatpush.msra.mxu1 %v88_v26  ;;  %237 = vmatpush.msra.mxu3 %v122_v36  ;;  %v118_v52 = vld [vmem:[#allocation5 + $0x1a8] sm:$0xff]  ;;  %v81_v54 = vld [vmem:[#allocation5 + $0x80] sm:$0xff]  ;;  %v144_v55 = vld [vmem:[#allocation5 + $0x278] sm:$0xff] }
  0x21   :  { %180 = vmatpush.msra.mxu0 %v71_v29  ;;  %218 = vmatpush.msra.mxu2 %v105_v35  ;;  %v160_v56 = vld [vmem:[#allocation5 + $0x2f8] sm:$0xff]  ;;  %v117_v58 = vld [vmem:[#allocation5 + $0x1a0] sm:$0xff]  ;;  %v143_v59 = vld [vmem:[#allocation5 + $0x270] sm:$0xff] }
  0x22   :  { %200 = vmatpush.msra.mxu1 %v87_v30  ;;  %238 = vmatpush.msra.mxu3 %v121_v40  ;;  %v100_v57 = vld [vmem:[#allocation5 + $0x118] sm:$0xff]  ;;  %v159_v60 = vld [vmem:[#allocation5 + $0x2f0] sm:$0xff]  ;;  %v142_v63 = vld [vmem:[#allocation5 + $0x268] sm:$0xff] }
  0x23   :  { %181 = vmatpush.msra.mxu0 %v70_v33  ;;  %219 = vmatpush.msra.mxu2 %v104_v39  ;;  %v99_v61 = vld [vmem:[#allocation5 + $0x110] sm:$0xff]  ;;  %v116_v62 = vld [vmem:[#allocation5 + $0x198] sm:$0xff]  ;;  %v158_v0 = vld [vmem:[#allocation5 + $0x2e8] sm:$0xff] }
  0x24   :  { %201 = vmatpush.msra.mxu1 %v86_v34  ;;  %239 = vmatpush.msra.mxu3 %v120_v44  ;;  %v98_v1 = vld [vmem:[#allocation5 + $0x108] sm:$0xff]  ;;  %v115_v2 = vld [vmem:[#allocation5 + $0x190] sm:$0xff]  ;;  %v141_v3 = vld [vmem:[#allocation5 + $0x260] sm:$0xff] }
  0x25   :  { %182 = vmatpush.msra.mxu0 %v69_v37  ;;  %220 = vmatpush.msra.mxu2 %v103_v43  ;;  %v157_v4 = vld [vmem:[#allocation5 + $0x2e0] sm:$0xff]  ;;  %v114_v6 = vld [vmem:[#allocation5 + $0x188] sm:$0xff]  ;;  %v140_v7 = vld [vmem:[#allocation5 + $0x258] sm:$0xff] }
  0x26   :  { %202 = vmatpush.msra.mxu1 %v85_v38  ;;  %240 = vmatpush.msra.mxu3 %v119_v48  ;;  %v97_v5 = vld [vmem:[#allocation5 + $0x100] sm:$0xff]  ;;  %v156_v8 = vld [vmem:[#allocation5 + $0x2d8] sm:$0xff]  ;;  %v139_v11 = vld [vmem:[#allocation5 + $0x250] sm:$0xff] }
  0x27   :  { %183 = vmatpush.msra.mxu0 %v68_v41  ;;  %221 = vmatpush.msra.mxu2 %v102_v47  ;;  %v60_v9 = vld [vmem:[#allocation2 + $0x10] sm:$0xff]  ;;  %v113_v10 = vld [vmem:[#allocation5 + $0x180] sm:$0xff]  ;;  %v155_v12 = vld [vmem:[#allocation5 + $0x2d0] sm:$0xff] }
  0x28   :  { %203 = vmatpush.msra.mxu1 %v84_v42  ;;  %241 = vmatpush.msra.mxu3 %v118_v52  ;;  %v162_v13 = vld [vmem:[#allocation5 + $0x308] sm:$0xff]  ;;  %v61_v17 = vld [vmem:[#allocation2 + $0x18] sm:$0xff]  ;;  %v59_v18 = vld [vmem:[#allocation2 + $0x8] sm:$0xff] }
  0x29   :  { %184 = vmatpush.msra.mxu0 %v67_v45  ;;  %222 = vmatpush.msra.mxu2 %v101_v51  ;;  %v58_v14 = vld [vmem:[#allocation2] sm:$0xff]  ;;  %v137_v19 = vld [vmem:[#allocation5 + $0x240] sm:$0xff]  ;;  %v136_v22 = vld [vmem:[#allocation5 + $0x238] sm:$0xff] }
  0x2a   :  { %204 = vmatpush.msra.mxu1 %v83_v46  ;;  %242 = vmatpush.msra.mxu3 %v117_v58  ;;  %v138_v15 = vld [vmem:[#allocation5 + $0x248] sm:$0xff]  ;;  %v153_v20 = vld [vmem:[#allocation5 + $0x2c0] sm:$0xff]  ;;  %v152_v23 = vld [vmem:[#allocation5 + $0x2b8] sm:$0xff] }
  0x2b   :  { %185 = vmatpush.msra.mxu0 %v66_v49  ;;  %223 = vmatpush.msra.mxu2 %v100_v57  ;;  %v154_v16 = vld [vmem:[#allocation5 + $0x2c8] sm:$0xff]  ;;  %v161_v21 = vld [vmem:[#allocation5 + $0x300] sm:$0xff]  ;;  %v64_v24 = vld [vmem:[#allocation2 + $0x30] sm:$0xff] }
  0x2c   :  { %205 = vmatpush.msra.mxu1 %v82_v50  ;;  %243 = vmatpush.msra.mxu3 %v116_v62  ;;  %v135_v25 = vld [vmem:[#allocation5 + $0x230] sm:$0xff]  ;;  %v134_v27 = vld [vmem:[#allocation5 + $0x228] sm:$0xff]  ;;  %v133_v29 = vld [vmem:[#allocation5 + $0x220] sm:$0xff] }
  0x2d   :  { %186 = vmatpush.msra.mxu0 %v65_v53  ;;  %224 = vmatpush.msra.mxu2 %v99_v61  ;;  %v151_v26 = vld [vmem:[#allocation5 + $0x2b0] sm:$0xff]  ;;  %v150_v28 = vld [vmem:[#allocation5 + $0x2a8] sm:$0xff]  ;;  %v149_v30 = vld [vmem:[#allocation5 + $0x2a0] sm:$0xff] }
  0x2e   :  { %206 = vmatpush.msra.mxu1 %v81_v54  ;;  %244 = vmatpush.msra.mxu3 %v115_v2  ;;  %v132_v31 = vld [vmem:[#allocation5 + $0x218] sm:$0xff]  ;;  %v131_v33 = vld [vmem:[#allocation5 + $0x210] sm:$0xff]  ;;  %v130_v35 = vld [vmem:[#allocation5 + $0x208] sm:$0xff] }
  0x2f   :  { %251 = vmatpush.msrb.mxu0 %v144_v55  ;;  %225 = vmatpush.msra.mxu2 %v98_v1  ;;  %v148_v32 = vld [vmem:[#allocation5 + $0x298] sm:$0xff]  ;;  %v147_v34 = vld [vmem:[#allocation5 + $0x290] sm:$0xff]  ;;  %v146_v36 = vld [vmem:[#allocation5 + $0x288] sm:$0xff] }
  0x30   :  { %271 = vmatpush.msrb.mxu1 %v160_v56  ;;  %245 = vmatpush.msra.mxu3 %v114_v6  ;;  %v129_v37 = vld [vmem:[#allocation5 + $0x200] sm:$0xff]  ;;  %v62_v39 = vld [vmem:[#allocation2 + $0x20] sm:$0xff]  ;;  %v63_v40 = vld [vmem:[#allocation2 + $0x28] sm:$0xff] }
  0x31   :  { %252 = vmatpush.msrb.mxu0 %v143_v59  ;;  %226 = vmatpush.msra.mxu2 %v97_v5  ;;  %v145_v38 = vld [vmem:[#allocation5 + $0x280] sm:$0xff]  ;;  %v337_v41 = vld [vmem:[#allocation7] ss:$0 sm:$0xff] }
  0x32   :  { %272 = vmatpush.msrb.mxu1 %v159_v60  ;;  %227 = vmatmul.f32.vlgmr.msra.gmra.mxu2 %v60_v9 }
  0x33   :  { %253 = vmatpush.msrb.mxu0 %v142_v63  ;;  %246 = vmatpush.msra.mxu3 %v113_v10 }
  0x34   :  { %273 = vmatpush.msrb.mxu1 %v158_v0  ;;  %305 = vmatpush.msrb.mxu2 %v162_v13 }
  0x35   :  { %254 = vmatpush.msrb.mxu0 %v141_v3  ;;  %247 = vmatmul.f32.vlgmr.msra.gmra.mxu3 %v61_v17 }
  0x36   :  { %274 = vmatpush.msrb.mxu1 %v157_v4  ;;  %187 = vmatmul.f32.vlgmr.msra.gmra.mxu0 %v58_v14 }
  0x37   :  { %255 = vmatpush.msrb.mxu0 %v140_v7  ;;  %207 = vmatmul.f32.vlgmr.msra.gmra.mxu1 %v59_v18 }
  0x38   :  { %275 = vmatpush.msrb.mxu1 %v156_v8  ;;  %306 = vmatpush.msrb.mxu2 %v161_v21 }
  0x39   :  { %256 = vmatpush.msrb.mxu0 %v139_v11 }
  0x3a   :  { %276 = vmatpush.msrb.mxu1 %v155_v12  ;;  %330 = vmatmul.msk.f32.vlgmr.msrb.gmra.mxu2 %vm167_vm0, %v64_v24 }
  0x3b   :  { %257 = vmatpush.msrb.mxu0 %v138_v15 }
  0x3c   :  { %277 = vmatpush.msrb.mxu1 %v154_v16 }
  0x3d   :  { %258 = vmatpush.msrb.mxu0 %v137_v19 }
  0x3e   :  { %278 = vmatpush.msrb.mxu1 %v153_v20 }
  0x3f   :  { %259 = vmatpush.msrb.mxu0 %v136_v22 }
  0x40   :  { %279 = vmatpush.msrb.mxu1 %v152_v23 }
  0x41   :  { %260 = vmatpush.msrb.mxu0 %v135_v25 }
  0x42   :  { %280 = vmatpush.msrb.mxu1 %v151_v26 }
  0x43   :  { %261 = vmatpush.msrb.mxu0 %v134_v27 }
  0x44   :  { %281 = vmatpush.msrb.mxu1 %v150_v28 }
  0x45   :  { %262 = vmatpush.msrb.mxu0 %v133_v29 }
  0x46   :  { %282 = vmatpush.msrb.mxu1 %v149_v30 }
  0x47   :  { %263 = vmatpush.msrb.mxu0 %v132_v31 }
  0x48   :  { %283 = vmatpush.msrb.mxu1 %v148_v32 }
  0x49   :  { %264 = vmatpush.msrb.mxu0 %v131_v33 }
  0x4a   :  { %284 = vmatpush.msrb.mxu1 %v147_v34 }
  0x4b   :  { %265 = vmatpush.msrb.mxu0 %v130_v35 }
  0x4c   :  { %285 = vmatpush.msrb.mxu1 %v146_v36 }
  0x4d   :  { %266 = vmatpush.msrb.mxu0 %v129_v37 }
  0x4e   :  { %286 = vmatpush.msrb.mxu1 %v145_v38  ;;  %267 = vmatmul.f32.vlgmr.msrb.gmra.mxu0 %v62_v39 }
  0x4f   :  { %287 = vmatmul.f32.vlgmr.msrb.gmra.mxu1 %v63_v40 }
  0xb3   :  { %v188_v42 = vpop.f32.mrf.mxu0 }
  0xb4   :  { %v189_v43 = vadd.f32 %v337_v41, %v188_v42  ;;  %v208_v44 = vpop.f32.mrf.mxu1 }
  0xb5   :  { %v228_v46 = vpop.f32.mrf.mxu2 }
  0xb6   :  { %v209_v45 = vadd.f32 %v208_v44, %v189_v43 }
  0xb8   :  { %v229_v47 = vadd.f32 %v228_v46, %v209_v45  ;;  %v248_v48 = vpop.f32.mrf.mxu3 }
  0xba   :  { %v249_v49 = vadd.f32 %v248_v48, %v229_v47 }
  0xbd   :  { %v308_v53 = vpop.f32.mrf.mxu2 }
  0xcb   :  { %v268_v50 = vpop.f32.mrf.mxu0 }
  0xcc   :  { %v288_v51 = vpop.f32.mrf.mxu1  ;;  %v269_v52 = vadd.f32 %v268_v50, %v249_v49 }
  0xce   :  { %v289_v54 = vadd.f32 %v288_v51, %v269_v52 }
  0xd0   :  { %v309_v55 = vadd.f32 %v308_v53, %v289_v54 }
  0xd2   :  { %311 = vst [vmem:[#allocation8] sm:$0xff] %v309_v55 }
  0xd3   :  { %322 = dma.vmem_to_hbm [thread:$0]  %s318_s2, 128, %s320_s30, [#allocation4]  }
  0xd4   :  { %438 = dma.done.wait [#allocation4], 128  }
  0xd5   :  { %439 = vsyncadd [#allocation4], 4294967168 }
  0xd6   :  { %327 = vsyncpa [#allocation3], 1 }
  0xd7   :  { %328 = vsyncpa [#allocation6], 1 }
  0xd8   :  { %329 = vsyncpa [#allocation4], 1 }

</bundles_post_ra>
